<compile_context>
chip_gen: v7x
topology: tpu7x:2x2x1
jax: 0.10.0
libtpu: 0.0.40
codegen_flags: <defaults>
</compile_context>

<pallas_src>
import functools

import jax
import jax.numpy as jnp
from jax.experimental import pallas as pl
from jax.experimental.pallas import tpu as pltpu


def _round_up(x, m):
    return (x + m - 1) // m * m


def _compiler_params(*block_bytes):
    """Right-sized scoped-VMEM request: double-buffered blocks + headroom,
    clamped so it always fits v7x's 64 MiB physical VMEM with room to spare."""
    need = 2 * sum(block_bytes) + (4 << 20)
    limit = int(min(max(need, 16 << 20), 48 << 20))
    return pltpu.CompilerParams(dimension_semantics=("parallel",),
                                vmem_limit_bytes=limit)


# ----------------------------- Pallas kernels -----------------------------

def _conv_bn_stats_kernel(a_ref, b_ref, y_ref, stats_ref):
    """One (tm, K_pad) x (K_pad, C_pad) MXU matmul; B is resident in VMEM.

    Writes the bf16 output tile plus per-channel sum / sum-of-squares (rows 0/1
    of an (8, C_pad) stats tile) so BatchNorm statistics come for free with the
    producer pass — the conv output is never re-read for stats.
    """
    y = jnp.dot(a_ref[...], b_ref[...], preferred_element_type=jnp.float32)
    stats_ref[0:1, :] = jnp.sum(y, axis=0, keepdims=True)
    stats_ref[1:2, :] = jnp.sum(y * y, axis=0, keepdims=True)
    y_ref[...] = y.astype(y_ref.dtype)


def _conv_lrelu_kernel(a_ref, b_ref, y_ref, *, slope):
    """No-BN path: matmul with LeakyReLU fused into the epilogue, no stats."""
    y = jnp.dot(a_ref[...], b_ref[...], preferred_element_type=jnp.float32)
    y_ref[...] = jnp.where(y > 0, y, slope * y).astype(y_ref.dtype)


def _bn_lrelu_kernel(y_ref, scale_ref, shift_ref, o_ref, *, slope):
    """Per-channel affine (folded BN) + LeakyReLU on one (tm, C_pad) tile."""
    z = y_ref[...].astype(jnp.float32) * scale_ref[...] + shift_ref[...]
    o_ref[...] = jnp.where(z > 0, z, slope * z).astype(o_ref.dtype)


# ----------------------------- Pallas wrappers -----------------------------

def conv_matmul_bn_stats(a, b, *, tm):
    """a:[M_pad,K_pad] bf16, b:[K_pad,C_pad] bf16 (resident) ->
       (y [M_pad,C_pad] bf16, stats [gm*8,C_pad] f32 with rows 0/1 valid)."""
    M_pad, K_pad = a.shape
    _, C_pad = b.shape
    gm = M_pad // tm
    blk = (tm * K_pad * 2, K_pad * C_pad * 2, tm * C_pad * 2, 8 * C_pad * 4)
    return pl.pallas_call(
        _conv_bn_stats_kernel,
        out_shape=(jax.ShapeDtypeStruct((M_pad, C_pad), jnp.bfloat16),
                   jax.ShapeDtypeStruct((gm * 8, C_pad), jnp.float32)),
        grid=(gm,),
        in_specs=[
            pl.BlockSpec((tm, K_pad), lambda i: (i, 0)),
            pl.BlockSpec((K_pad, C_pad), lambda i: (0, 0)),   # resident weights
        ],
        out_specs=(
            pl.BlockSpec((tm, C_pad), lambda i: (i, 0)),
            pl.BlockSpec((8, C_pad), lambda i: (i, 0)),
        ),
        compiler_params=_compiler_params(*blk),
    )(a, b)


def conv_matmul_lrelu(a, b, *, tm, slope):
    """No-BN path: a @ b with fused LeakyReLU -> [M_pad, C_pad] f32."""
    M_pad, K_pad = a.shape
    _, C_pad = b.shape
    gm = M_pad // tm
    blk = (tm * K_pad * 2, K_pad * C_pad * 2, tm * C_pad * 4)
    return pl.pallas_call(
        functools.partial(_conv_lrelu_kernel, slope=slope),
        out_shape=jax.ShapeDtypeStruct((M_pad, C_pad), jnp.float32),
        grid=(gm,),
        in_specs=[
            pl.BlockSpec((tm, K_pad), lambda i: (i, 0)),
            pl.BlockSpec((K_pad, C_pad), lambda i: (0, 0)),   # resident weights
        ],
        out_specs=pl.BlockSpec((tm, C_pad), lambda i: (i, 0)),
        compiler_params=_compiler_params(*blk),
    )(a, b)


def bn_lrelu_apply(y, scale, shift, *, tm, slope):
    """y:[M_pad,C_pad] bf16, scale/shift:[1,C_pad] f32 -> [M_pad,C_pad] f32."""
    M_pad, C_pad = y.shape
    blk = (tm * C_pad * 2, C_pad * 4, C_pad * 4, tm * C_pad * 4)
    return pl.pallas_call(
        functools.partial(_bn_lrelu_kernel, slope=slope),
        out_shape=jax.ShapeDtypeStruct((M_pad, C_pad), jnp.float32),
        grid=(M_pad // tm,),
        in_specs=[
            pl.BlockSpec((tm, C_pad), lambda i: (i, 0)),
            pl.BlockSpec((1, C_pad), lambda i: (0, 0)),
            pl.BlockSpec((1, C_pad), lambda i: (0, 0)),
        ],
        out_specs=pl.BlockSpec((tm, C_pad), lambda i: (i, 0)),
        compiler_params=_compiler_params(*blk),
    )(y, scale, shift)


# ------------------------------ Conv2d lowering ------------------------------

def _im2col(x, k, stride, padding, dtype):
    """x: [N, C, H, W] -> (patches [N*Ho*Wo, C*k*k] in `dtype`, Ho, Wo).

    The cast to `dtype` (bf16) happens BEFORE the k*k/stride^2 expansion so the
    dominant layout-glue stage moves half the HBM bytes of an f32 im2col.
    # TODO(synk): longer term, feed the padded NHWC input to the matmul kernel
    # directly (shifted sub-views via extra grid axes, or a P4 manual-DMA
    # gather) and skip materializing the patches array in HBM entirely.
    """
    N, C, H, W = x.shape
    xp = jnp.pad(x.astype(dtype),
                 ((0, 0), (0, 0), (padding, padding), (padding, padding)))
    Hp, Wp = H + 2 * padding, W + 2 * padding
    Ho = (Hp - k) // stride + 1
    Wo = (Wp - k) // stride + 1
    cols = []
    for i in range(k):
        for j in range(k):
            cols.append(xp[:, :, i:i + stride * Ho:stride,
                           j:j + stride * Wo:stride])      # [N, C, Ho, Wo]
    pt = jnp.stack(cols, axis=2)                            # [N, C, k*k, Ho, Wo]
    pt = pt.transpose(0, 3, 4, 1, 2).reshape(N * Ho * Wo, C * k * k)
    return pt, Ho, Wo


# ------------------------------- layer forward -------------------------------

def dcgan_disc_layer(x, weight, gamma=None, beta=None, *, stride=1, padding=0,
                     batch_norm=True, eps=1e-5, negative_slope=0.2):
    """Forward of DCGANDiscLayer.

    x:      [N, C_in, H, W]  float32 (NCHW, PyTorch layout at the boundary)
    weight: [C_out, C_in, k, k]  (PyTorch Conv2d weight, bias=False)
    gamma/beta: [C_out] BatchNorm2d affine params (defaults: 1 / 0, torch init)

    Note: conv/matmul operands are deliberately bf16 (MXU fast path); the BN
    statistics are accumulated in f32 from the MXU accumulator.
    """
    N, Cin, H, W = x.shape
    Cout, Cin2, k, _ = weight.shape
    assert Cin == Cin2

    patches, Ho, Wo = _im2col(x, k, stride, padding, jnp.bfloat16)
    M = N * Ho * Wo
    K = Cin * k * k

    # ---- tile sizes (robust to any batch / channel count) ----
    C_pad = _round_up(Cout, 128)                 # lane-dense output
    K_pad = _round_up(K, 128)                    # full B resident in VMEM
    tm = 512 if M >= 512 else _round_up(M, 8)
    M_pad = _round_up(M, tm)

    # ---- bf16 matmul operands, single pad to tile boundaries ----
    a = jnp.pad(patches, ((0, M_pad - M), (0, K_pad - K)))
    wmat = weight.transpose(1, 2, 3, 0).reshape(K, Cout).astype(jnp.bfloat16)
    b = jnp.pad(wmat, ((0, K_pad - K), (0, C_pad - Cout)))

    if batch_norm:
        y, stats = conv_matmul_bn_stats(a, b, tm=tm)

        # Tiny cross-tile reduction of the fused per-tile stats (XLA glue on a
        # (gm, C_pad)-sized slab).  Padded rows/columns are all-zero so they
        # add nothing; divide by the true element count M.
        gm = M_pad // tm
        st = stats.reshape(gm, 8, C_pad)
        total = jnp.sum(st[:, 0, :], axis=0)
        total_sq = jnp.sum(st[:, 1, :], axis=0)
        mean = total / M
        var = jnp.maximum(total_sq / M - mean * mean, 0.0)  # biased var (torch BN fwd)

        if gamma is None:
            gamma = jnp.ones((Cout,), jnp.float32)
        if beta is None:
            beta = jnp.zeros((Cout,), jnp.float32)
        g = jnp.pad(gamma.astype(jnp.float32), (0, C_pad - Cout))
        bb = jnp.pad(beta.astype(jnp.float32), (0, C_pad - Cout))

        inv_std = jax.lax.rsqrt(var + eps)
        scale = (g * inv_std).reshape(1, C_pad)
        shift = (bb - mean * g * inv_std).reshape(1, C_pad)

        # Bigger row tiles for the purely elementwise apply pass.
        tm_bn = tm
        while tm_bn * 2 <= min(M_pad, 2048) and M_pad % (tm_bn * 2) == 0:
            tm_bn *= 2
        y = bn_lrelu_apply(y, scale, shift, tm=tm_bn, slope=negative_slope)
    else:
        # LeakyReLU fused directly into the matmul epilogue; no stats output.
        y = conv_matmul_lrelu(a, b, tm=tm, slope=negative_slope)

    out = y[:M, :Cout].reshape(N, Ho, Wo, Cout).transpose(0, 3, 1, 2)
    return out


# ------------------------------- JAX reference -------------------------------

def reference_disc_layer(x, w, gamma, beta, *, stride, padding, batch_norm,
                         eps=1e-5, slope=0.2):
    y = jax.lax.conv_general_dilated(
        x, w, window_strides=(stride, stride),
        padding=[(padding, padding), (padding, padding)],
        dimension_numbers=("NCHW", "OIHW", "NCHW"))
    if batch_norm:
        mean = jnp.mean(y, axis=(0, 2, 3), keepdims=True)
        var = jnp.mean((y - mean) ** 2, axis=(0, 2, 3), keepdims=True)
        y = (y - mean) * jax.lax.rsqrt(var + eps)
        y = y * gamma.reshape(1, -1, 1, 1) + beta.reshape(1, -1, 1, 1)
    return jnp.where(y > 0, y, slope * y)


# ------------------------------------ main ------------------------------------

if __name__ == "__main__":
    key = jax.random.PRNGKey(0)
    kx1, kw1, kx2, kw2 = jax.random.split(key, 4)

    # Config 1: inner discriminator layer style (batch_norm=True).
    x1 = jax.random.normal(kx1, (2, 8, 16, 16), dtype=jnp.float32)
    w1 = 0.02 * jax.random.normal(kw1, (16, 8, 4, 4), dtype=jnp.float32)
    g1 = jnp.ones((16,), jnp.float32)    # torch BatchNorm2d init: weight=1
    b1 = jnp.zeros((16,), jnp.float32)   #                         bias=0
    out1 = dcgan_disc_layer(x1, w1, g1, b1, stride=2, padding=1,
                            batch_norm=True)
    ref1 = reference_disc_layer(x1, w1, g1, b1, stride=2, padding=1,
                                batch_norm=True)

    # Config 2: first discriminator layer style (batch_norm=False).
    x2 = jax.random.normal(kx2, (2, 3, 16, 16), dtype=jnp.float32)
    w2 = 0.02 * jax.random.normal(kw2, (8, 3, 4, 4), dtype=jnp.float32)
    out2 = dcgan_disc_layer(x2, w2, stride=2, padding=1, batch_norm=False)
    ref2 = reference_disc_layer(x2, w2, None, None, stride=2, padding=1,
                                batch_norm=False)

    out1, out2 = jax.block_until_ready((out1, out2))

    assert out1.shape == (2, 16, 8, 8), out1.shape
    assert out2.shape == (2, 8, 8, 8), out2.shape
    assert bool(jnp.all(jnp.isfinite(out1))) and bool(jnp.all(jnp.isfinite(out2)))
    err1 = float(jnp.max(jnp.abs(out1 - ref1)))
    err2 = float(jnp.max(jnp.abs(out2 - ref2)))
    assert err1 < 3e-2, f"BN layer mismatch: {err1}"
    assert err2 < 3e-2, f"no-BN layer mismatch: {err2}"
    print("KERNEL_OK")
</pallas_src>

<mosaic_0001>
module attributes {stable_mosaic.version = 11 : i64} {
  func.func @_conv_bn_stats_kernel(%arg0: i32, %arg1: memref<128x128xbf16, #tpu.memory_space<vmem>>, %arg2: memref<128x128xbf16, #tpu.memory_space<vmem>>, %arg3: memref<128x128xbf16, #tpu.memory_space<vmem>>, %arg4: memref<8x128xf32, #tpu.memory_space<vmem>>) attributes {dimension_semantics = [#tpu.dimension_semantics<parallel>], iteration_bounds = array<i64: 1>, scalar_prefetch = 0 : i64, scratch_operands = 0 : i64, tpu.core_type = #tpu.core_type<tc>, window_params = [{transform_indices = @transform_0, window_bounds = array<i64: 128, 128>}, {pipeline_mode = #tpu.pipeline_mode<synchronous>, transform_indices = @transform_1, window_bounds = array<i64: 128, 128>}, {transform_indices = @transform_2, window_bounds = array<i64: 128, 128>}, {transform_indices = @transform_3, window_bounds = array<i64: 8, 128>}]} {
    %c0 = arith.constant 0 : index
    %c0_0 = arith.constant 0 : index
    %0 = vector.load %arg1[%c0, %c0_0] : memref<128x128xbf16, #tpu.memory_space<vmem>>, vector<128x128xbf16>
    %c0_1 = arith.constant 0 : index
    %c0_2 = arith.constant 0 : index
    %1 = vector.load %arg2[%c0_1, %c0_2] : memref<128x128xbf16, #tpu.memory_space<vmem>>, vector<128x128xbf16>
    %cst = arith.constant dense<0.000000e+00> : vector<128x128xf32>
    %2 = tpu.matmul %0, %1, %cst {dimension_numbers = #tpu.dot_dimension_numbers<[1], [0], [0], [1], [0, 0, 1, 1], [], []>} : vector<128x128xbf16>, vector<128x128xbf16>, vector<128x128xf32> -> vector<128x128xf32>
    %cst_3 = arith.constant dense<0.000000e+00> : vector<128xf32>
    %3 = vector.multi_reduction <add>, %2, %cst_3 [0] : vector<128x128xf32> to vector<128xf32>
    %4 = vector.shape_cast %3 : vector<128xf32> to vector<1x128xf32>
    %c0_4 = arith.constant 0 : index
    %c0_5 = arith.constant 0 : index
    %5 = vector.load %arg4[%c0_4, %c0_5] : memref<8x128xf32, #tpu.memory_space<vmem>>, vector<1x128xf32>
    tpu.vector_store %arg4[%c0_4, %c0_5], %4 {strides = array<i32>} : memref<8x128xf32, #tpu.memory_space<vmem>>, vector<1x128xf32>,
    %6 = arith.mulf %2, %2 : vector<128x128xf32>
    %cst_6 = arith.constant dense<0.000000e+00> : vector<128xf32>
    %7 = vector.multi_reduction <add>, %6, %cst_6 [0] : vector<128x128xf32> to vector<128xf32>
    %8 = vector.shape_cast %7 : vector<128xf32> to vector<1x128xf32>
    %c1 = arith.constant 1 : index
    %c0_7 = arith.constant 0 : index
    %9 = vector.load %arg4[%c1, %c0_7] : memref<8x128xf32, #tpu.memory_space<vmem>>, vector<1x128xf32>
    tpu.vector_store %arg4[%c1, %c0_7], %8 {strides = array<i32>} : memref<8x128xf32, #tpu.memory_space<vmem>>, vector<1x128xf32>,
    %10 = arith.truncf %2 : vector<128x128xf32> to vector<128x128xbf16>
    %c0_8 = arith.constant 0 : index
    %c0_9 = arith.constant 0 : index
    %11 = vector.load %arg3[%c0_8, %c0_9] : memref<128x128xbf16, #tpu.memory_space<vmem>>, vector<128x128xbf16>
    tpu.vector_store %arg3[%c0_8, %c0_9], %10 {strides = array<i32>} : memref<128x128xbf16, #tpu.memory_space<vmem>>, vector<128x128xbf16>,
    return
  }
  func.func @transform_0(%arg0: i32) -> (i32, i32) {
    %c0_i32 = arith.constant 0 : i32
    %c0_i32_0 = arith.constant 0 : i32
    return %arg0, %c0_i32 : i32, i32
  }
  func.func @transform_1(%arg0: i32) -> (i32, i32) {
    %c0_i32 = arith.constant 0 : i32
    %c0_i32_0 = arith.constant 0 : i32
    %c0_i32_1 = arith.constant 0 : i32
    return %c0_i32, %c0_i32_0 : i32, i32
  }
  func.func @transform_2(%arg0: i32) -> (i32, i32) {
    %c0_i32 = arith.constant 0 : i32
    %c0_i32_0 = arith.constant 0 : i32
    return %arg0, %c0_i32 : i32, i32
  }
  func.func @transform_3(%arg0: i32) -> (i32, i32) {
    %c0_i32 = arith.constant 0 : i32
    %c0_i32_0 = arith.constant 0 : i32
    return %arg0, %c0_i32 : i32, i32
  }
}

</mosaic_0001>

<bundles_post_ra>
// kernel: tpu_custom_call.1
= control target key start
LH: loop header
LB: loop body
LE: loop exit
PB: predicated region body
PF: predicated region fallthrough
CT: control target
= control target key end

     0   :  { %9 = vsyncpa [#allocation3], 0  ;;  %s825_s0 = inlined_call_operand.hbm [shape: bf16[128,128], index: 0, kind: input, shape index: {}]   ;;  %s826_s1 = inlined_call_operand.hbm [shape: bf16[128,128], index: 1, kind: input, shape index: {}]   ;;  %s827_s2 = inlined_call_operand.hbm [shape: bf16[128,128], index: 2, kind: output, shape index: {0}]   ;;  %s828_s3 = inlined_call_operand.hbm [shape: f32[8,128], index: 3, kind: output, shape index: {1}]  }
   0x1   :  { %10 = vsyncpa [#allocation6], 0 }
   0x2   :  { %11 = vsyncpa [#allocation4], 0 }
   0x3   :  { %12 = vsyncpa [#allocation9], 0  ;;  %s718_s12 = smov [#allocation2]   ;;  %s622_s16 = scalar_lea.hbm %s825_s0, 1024 }
   0x4   :  { %s18_s13 = sshll.u32 %s718_s12, 4  ;;  %p623_p0 = scmp.ne.s32.totalorder %s825_s0, %s622_s16  ;;  %s19_s13 = int_to_ptr.vmem [resolvable:$true] %s18_s13 }
   0x5   :  { %p626_p1 = scmp.lt.u32.totalorder %s622_s16, %s825_s0 }
   0x7   :  { %p628_p2 = pnand %p626_p1, %p623_p0 }
   0x9   :  { %631 = shalt.err (!%p628_p2)
}
   0xa   :  { %s632_s21 = scalar_lea.vmem %s19_s13, 1024  ;;  %p637_p4 = scmp.lt.s32.totalorder %s19_s13, %s19_s13 }
   0xb   :  { %p633_p3 = scmp.ne.s32.totalorder %s19_s13, %s632_s21  ;;  %p638_p5 = scmp.lt.s32.totalorder %s632_s21, %s632_s21 }
   0xd   :  { %p639_p6 = por %p638_p5, %p637_p4 }
   0xf   :  { %p640_p7 = pnand %p639_p6, %p633_p3 }
  0x11   :  { %643 = shalt.err (!%p640_p7)
}
  0x12   :  { %s719_s22 = smov 64   ;;  %s720_s23 = smov 4  }
  0x13   :  { %24 = dma.hbm_to_vmem [thread:$0]  %s825_s0, 1024, %s19_s13, [#allocation3], %s719_s22, %s719_s22, %s720_s23  }
  0x14   :  { %s721_s26 = smov [#allocation5]   ;;  %s644_s30 = scalar_lea.hbm %s826_s1, 1024 }
  0x15   :  { %s30_s27 = sshll.u32 %s721_s26, 4  ;;  %p645_p8 = scmp.ne.s32.totalorder %s826_s1, %s644_s30  ;;  %s31_s27 = int_to_ptr.vmem [resolvable:$true] %s30_s27 }
  0x16   :  { %p648_p9 = scmp.lt.u32.totalorder %s644_s30, %s826_s1 }
  0x18   :  { %p650_p10 = pnand %p648_p9, %p645_p8 }
  0x1a   :  { %653 = shalt.err (!%p650_p10)
}
  0x1b   :  { %s654_s8 = scalar_lea.vmem %s31_s27, 1024  ;;  %p659_p12 = scmp.lt.s32.totalorder %s31_s27, %s31_s27 }
  0x1c   :  { %p655_p11 = scmp.ne.s32.totalorder %s31_s27, %s654_s8  ;;  %p660_p13 = scmp.lt.s32.totalorder %s654_s8, %s654_s8 }
  0x1e   :  { %p661_p0 = por %p660_p13, %p659_p12 }
  0x20   :  { %p662_p1 = pnand %p661_p0, %p655_p11 }
  0x22   :  { %665 = shalt.err (!%p662_p1)
}
  0x23   :  { %36 = dma.hbm_to_vmem [thread:$0]  %s826_s1, 1024, %s31_s27, [#allocation6], %s719_s22, %s719_s22, %s720_s23  }
  0x24   :  { %710 = dma.done.wait [#allocation3], 1024  }
  0x25   :  { %711 = vsyncadd [#allocation3], 4294966272 }
  0x26   :  { %712 = dma.done.wait [#allocation6], 1024  }
  0x27   :  { %713 = vsyncadd [#allocation6], 4294966272  ;;  %v606_v0 = vld [vmem:[#allocation5] sm:$0xff]   ;;  %v607_v1 = vld [vmem:[#allocation5 + $0x8] sm:$0xff]   ;;  %s722_s1 = smov [#allocation7]  }
  0x28   :  { %552 = vmatprep.subr.bf16.mxu0 %v606_v0  ;;  %584 = vmatprep.subr.bf16.mxu1 %v606_v0  ;;  %v608_v2 = vld [vmem:[#allocation5 + $0x10] sm:$0xff]   ;;  %v609_v3 = vld [vmem:[#allocation5 + $0x18] sm:$0xff]   ;;  %v614_v4 = vld [vmem:[#allocation2] sm:$0xff]   ;;  %s414_s10 = sshll.u32 %s722_s1, 4  ;;  %s415_s10 = int_to_ptr.vmem [resolvable:$true] %s414_s10 }
  0x29   :  { %553 = vmatpush3.bf16.msra.mxu0 %v606_v0  ;;  %592 = vmatpush3.bf16.msra.mxu1 %v606_v0  ;;  %v610_v5 = vld [vmem:[#allocation5 + $0x20] sm:$0xff]   ;;  %v611_v7 = vld [vmem:[#allocation5 + $0x28] sm:$0xff]   ;;  %v612_v8 = vld [vmem:[#allocation5 + $0x30] sm:$0xff]   ;;  %s666_s11 = scalar_lea.vmem %s415_s10, 1024  ;;  %p671_p3 = scmp.lt.s32.totalorder %s415_s10, %s415_s10 }
  0x2a   :  { %554 = vmatprep.subr.bf16.mxu0 %v607_v1  ;;  %585 = vmatprep.subr.bf16.mxu1 %v607_v1  ;;  %v618_v6 = vld [vmem:[#allocation2 + $0x20] sm:$0xff]   ;;  %v613_v9 = vld [vmem:[#allocation5 + $0x38] sm:$0xff]   ;;  %v615_v10 = vld [vmem:[#allocation2 + $0x8] sm:$0xff]   ;;  %p667_p2 = scmp.ne.s32.totalorder %s415_s10, %s666_s11  ;;  %p672_p4 = scmp.lt.s32.totalorder %s666_s11, %s666_s11 }
  0x2b   :  { %568 = vmatprep.mubr.bf16.mxu0 %v614_v4  ;;  %576 = vmatprep.mubr.bf16.mxu1 %v618_v6  ;;  %v619_v11 = vld [vmem:[#allocation2 + $0x28] sm:$0xff]   ;;  %v616_v12 = vld [vmem:[#allocation2 + $0x10] sm:$0xff]   ;;  %v617_v14 = vld [vmem:[#allocation2 + $0x18] sm:$0xff]  }
  0x2c   :  { %v620_v13 = vld [vmem:[#allocation2 + $0x30] sm:$0xff]   ;;  %v621_v15 = vld [vmem:[#allocation2 + $0x38] sm:$0xff]   ;;  %p673_p5 = por %p672_p4, %p671_p3 }
  0x2d   :  { %555 = vmatpush3.bf16.msra.mxu0 %v607_v1  ;;  %593 = vmatpush3.bf16.msra.mxu1 %v607_v1 }
  0x2e   :  { %556 = vmatprep.subr.bf16.mxu0 %v608_v2  ;;  %586 = vmatprep.subr.bf16.mxu1 %v608_v2  ;;  %p674_p6 = pnand %p673_p5, %p667_p2 }
  0x31   :  { %557 = vmatpush3.bf16.msra.mxu0 %v608_v2  ;;  %594 = vmatpush3.bf16.msra.mxu1 %v608_v2 }
  0x32   :  { %558 = vmatprep.subr.bf16.mxu0 %v609_v3  ;;  %587 = vmatprep.subr.bf16.mxu1 %v609_v3 }
  0x35   :  { %559 = vmatpush3.bf16.msra.mxu0 %v609_v3  ;;  %595 = vmatpush3.bf16.msra.mxu1 %v609_v3 }
  0x36   :  { %560 = vmatprep.subr.bf16.mxu0 %v610_v5  ;;  %588 = vmatprep.subr.bf16.mxu1 %v610_v5 }
  0x39   :  { %561 = vmatpush3.bf16.msra.mxu0 %v610_v5  ;;  %596 = vmatpush3.bf16.msra.mxu1 %v610_v5 }
  0x3a   :  { %562 = vmatprep.subr.bf16.mxu0 %v611_v7  ;;  %589 = vmatprep.subr.bf16.mxu1 %v611_v7 }
  0x3d   :  { %563 = vmatpush3.bf16.msra.mxu0 %v611_v7  ;;  %597 = vmatpush3.bf16.msra.mxu1 %v611_v7 }
  0x3e   :  { %564 = vmatprep.subr.bf16.mxu0 %v612_v8  ;;  %590 = vmatprep.subr.bf16.mxu1 %v612_v8 }
  0x41   :  { %565 = vmatpush3.bf16.msra.mxu0 %v612_v8  ;;  %598 = vmatpush3.bf16.msra.mxu1 %v612_v8 }
  0x42   :  { %566 = vmatprep.subr.bf16.mxu0 %v613_v9  ;;  %591 = vmatprep.subr.bf16.mxu1 %v613_v9 }
  0x45   :  { %567 = vmatpush3.bf16.msra.mxu0 %v613_v9  ;;  %599 = vmatpush3.bf16.msra.mxu1 %v613_v9 }
  0x48   :  { %569 = vmatmul.mubr.bf16.vlgmr.msra.gmra.mrb[0].mxu0 %v615_v10  ;;  %577 = vmatmul.mubr.bf16.vlgmr.msra.gmra.mrb[0].mxu1 %v619_v11 }
  0x49   :  { %572 = vmatprep.mubr.bf16.mxu0 %v616_v12  ;;  %580 = vmatprep.mubr.bf16.mxu1 %v620_v13 }
  0x50   :  { %573 = vmatmul.mubr.bf16.gmra.mrb[4].mxu0 %v617_v14  ;;  %581 = vmatmul.mubr.bf16.gmra.mrb[4].mxu1 %v621_v15 }
 0x11b   :  { %v570_v16 = vpop.f32.mrb[0].mxu0  ;;  %v774_v17 = vpop.f32.mrb[0].mxu1 }
 0x11c   :  { %v206_v18 = vpop.f32.mrb[1].mxu0  ;;  %v776_v19 = vpop.f32.mrb[1].mxu1  ;;  %v293_v31 = vmul.f32 %v570_v16, %v570_v16 }
 0x11d   :  { %v571_v20 = vpop.f32.mrb[2].mxu0  ;;  %v778_v21 = vpop.f32.mrb[2].mxu1  ;;  %v291_v26 = vmul.f32 %v206_v18, %v206_v18  ;;  %v299_v61 = vmul.f32 %v776_v19, %v776_v19 }
 0x11e   :  { %v497_v22 = vpack.c.bf16 %v571_v20, %v570_v16  ;;  %v209_v23 = vpop.f32.mrb[3].mxu0  ;;  %v517_v24 = vpack.c.bf16 %v778_v21, %v774_v17  ;;  %v782_v25 = vpop.f32.mrb[3].mxu1  ;;  %v294_v34 = vmul.f32 %v571_v20, %v571_v20 }
 0x11f   :  { %v269_v27 = vadd.f32 %v209_v23, %v206_v18  ;;  %v292_v28 = vmul.f32 %v209_v23, %v209_v23  ;;  %v492_v29 = vpack.c.bf16 %v209_v23, %v206_v18  ;;  %v512_v30 = vpack.c.bf16 %v782_v25, %v776_v19 }
 0x120   :  { %529 = vst [vmem:[#allocation7 + $0x8] sm:$0xff] %v497_v22   ;;  %533 = vst [vmem:[#allocation7 + $0x28] sm:$0xff] %v517_v24  }
 0x121   :  { %v270_v32 = vadd.f32 %v570_v16, %v269_v27  ;;  %v307_v33 = vadd.f32 %v292_v28, %v291_v26  ;;  %493 = vst [vmem:[#allocation7] sm:$0xff] %v492_v29   ;;  %532 = vst [vmem:[#allocation7 + $0x20] sm:$0xff] %v512_v30  }
 0x123   :  { %v308_v35 = vadd.f32 %v307_v33, %v293_v31  ;;  %v574_v36 = vpop.f32.mrb[4].mxu0  ;;  %v271_v37 = vadd.f32 %v571_v20, %v270_v32  ;;  %v582_v38 = vpop.f32.mrb[4].mxu1 }
 0x124   :  { %v222_v39 = vpop.f32.mrb[5].mxu0  ;;  %v254_v40 = vpop.f32.mrb[5].mxu1  ;;  %v297_v55 = vmul.f32 %v574_v36, %v574_v36 }
 0x125   :  { %v272_v41 = vadd.f32 %v271_v37, %v222_v39  ;;  %v295_v42 = vmul.f32 %v222_v39, %v222_v39  ;;  %v309_v43 = vadd.f32 %v308_v35, %v294_v34  ;;  %v575_v44 = vpop.f32.mrb[6].mxu0  ;;  %v583_v45 = vpop.f32.mrb[6].mxu1 }
 0x126   :  { %v507_v46 = vpack.c.bf16 %v575_v44, %v574_v36  ;;  %v225_v47 = vpop.f32.mrb[7].mxu0  ;;  %v527_v48 = vpack.c.bf16 %v583_v45, %v582_v38  ;;  %v257_v49 = vpop.f32.mrb[7].mxu1  ;;  %v298_v58 = vmul.f32 %v575_v44, %v575_v44 }
 0x127   :  { %v310_v50 = vadd.f32 %v309_v43, %v295_v42  ;;  %v273_v51 = vadd.f32 %v272_v41, %v225_v47  ;;  %v296_v52 = vmul.f32 %v225_v47, %v225_v47  ;;  %v502_v53 = vpack.c.bf16 %v225_v47, %v222_v39 }
 0x128   :  { %531 = vst [vmem:[#allocation7 + $0x18] sm:$0xff] %v507_v46   ;;  %535 = vst [vmem:[#allocation7 + $0x38] sm:$0xff] %v527_v48   ;;  %v522_v54 = vpack.c.bf16 %v257_v49, %v254_v40 }
 0x129   :  { %v274_v56 = vadd.f32 %v574_v36, %v273_v51  ;;  %v311_v57 = vadd.f32 %v310_v50, %v296_v52  ;;  %530 = vst [vmem:[#allocation7 + $0x10] sm:$0xff] %v502_v53  }
 0x12a   :  { %534 = vst [vmem:[#allocation7 + $0x30] sm:$0xff] %v522_v54  }
 0x12b   :  { %v312_v59 = vadd.f32 %v311_v57, %v297_v55  ;;  %v275_v60 = vadd.f32 %v575_v44, %v274_v56 }
 0x12c   :  { %677 = shalt.err (!%p674_p6)
}
 0x12d   :  { %s678_s14 = scalar_lea.hbm %s827_s2, 1024 }
 0x12e   :  { %p679_p7 = scmp.ne.s32.totalorder %s827_s2, %s678_s14  ;;  %p682_p8 = scmp.lt.u32.totalorder %s678_s14, %s827_s2 }
 0x130   :  { %p684_p9 = pnand %p682_p8, %p679_p7 }
 0x132   :  { %687 = shalt.err (!%p684_p9)
}
 0x133   :  { %420 = dma.vmem_to_hbm [thread:$0]  %s415_s10, 1024, %s827_s2, [#allocation4], %s719_s22, %s719_s22, %s720_s23   ;;  %v276_v62 = vadd.f32 %v275_v60, %v776_v19  ;;  %v313_v63 = vadd.f32 %v312_v59, %v298_v58  ;;  %v300_v2 = vmul.f32 %v782_v25, %v782_v25  ;;  %v301_v3 = vmul.f32 %v774_v17, %v774_v17 }
 0x134   :  { %v302_v6 = vmul.f32 %v778_v21, %v778_v21  ;;  %v303_v9 = vmul.f32 %v254_v40, %v254_v40  ;;  %v304_v14 = vmul.f32 %v257_v49, %v257_v49  ;;  %v305_v15 = vmul.f32 %v582_v38, %v582_v38  ;;  %s723_s2 = smov [#allocation8]  }
 0x135   :  { %v314_v0 = vadd.f32 %v313_v63, %v299_v61  ;;  %v277_v1 = vadd.f32 %v276_v62, %v782_v25  ;;  %v306_v19 = vmul.f32 %v583_v45, %v583_v45  ;;  %s427_s21 = sshll.u32 %s723_s2, 4  ;;  %s428_s21 = int_to_ptr.vmem [resolvable:$true] %s427_s21 }
 0x136   :  { %s688_s22 = scalar_lea.vmem %s428_s21, 128  ;;  %p693_p11 = scmp.lt.s32.totalorder %s428_s21, %s428_s21 }
 0x137   :  { %v278_v4 = vadd.f32 %v774_v17, %v277_v1  ;;  %v315_v5 = vadd.f32 %v314_v0, %v300_v2  ;;  %p689_p10 = scmp.ne.s32.totalorder %s428_s21, %s688_s22  ;;  %p694_p12 = scmp.lt.s32.totalorder %s688_s22, %s688_s22 }
 0x139   :  { %v316_v7 = vadd.f32 %v315_v5, %v301_v3  ;;  %v279_v8 = vadd.f32 %v778_v21, %v278_v4  ;;  %p695_p13 = por %p694_p12, %p693_p11 }
 0x13b   :  { %v280_v10 = vadd.f32 %v279_v8, %v254_v40  ;;  %v317_v11 = vadd.f32 %v316_v7, %v302_v6  ;;  %p696_p0 = pnand %p695_p13, %p689_p10 }
 0x13d   :  { %v318_v12 = vadd.f32 %v317_v11, %v303_v9  ;;  %v281_v13 = vadd.f32 %v280_v10, %v257_v49 }
 0x13f   :  { %v282_v16 = vadd.f32 %v582_v38, %v281_v13  ;;  %v319_v18 = vadd.f32 %v318_v12, %v304_v14 }
 0x141   :  { %v283_v20 = vadd.f32 %v583_v45, %v282_v16  ;;  %v320_v22 = vadd.f32 %v319_v18, %v305_v15 }
 0x143   :  { %v284_v17 = vrot.slane %v283_v20, 4  ;;  %v321_v23 = vadd.f32 %v320_v22, %v306_v19 }
 0x145   :  { %v285_v24 = vadd.f32 %v284_v17, %v283_v20  ;;  %v322_v25 = vrot.slane %v321_v23, 4 }
 0x147   :  { %v286_v26 = vrot.slane %v285_v24, 2  ;;  %v323_v27 = vadd.f32 %v322_v25, %v321_v23 }
 0x149   :  { %v287_v28 = vadd.f32 %v286_v26, %v285_v24  ;;  %v324_v21 = vrot.slane %v323_v27, 2 }
 0x14b   :  { %v288_v29 = vrot.slane %v287_v28, 1  ;;  %v325_v30 = vadd.f32 %v324_v21, %v323_v27 }
 0x14d   :  { %v289_v31 = vadd.f32 %v288_v29, %v287_v28  ;;  %v326_v32 = vrot.slane %v325_v30, 1 }
 0x14f   :  { %290 = vst [vmem:[#allocation8] sm:$0x1] %v289_v31  ;;  %v327_v33 = vadd.f32 %v326_v32, %v325_v30 }
 0x151   :  { %328 = vst [vmem:[#allocation8 + $0x1] sm:$0x1] %v327_v33 }
 0x152   :  { %699 = shalt.err (!%p696_p0)
}
 0x153   :  { %s700_s25 = scalar_lea.hbm %s828_s3, 128 }
 0x154   :  { %p701_p1 = scmp.ne.s32.totalorder %s828_s3, %s700_s25  ;;  %p704_p2 = scmp.lt.u32.totalorder %s700_s25, %s828_s3 }
 0x156   :  { %p706_p3 = pnand %p704_p2, %p701_p1 }
 0x158   :  { %709 = shalt.err (!%p706_p3)
}
 0x159   :  { %430 = dma.vmem_to_hbm [thread:$0]  %s428_s21, 128, %s828_s3, [#allocation9]  }
 0x15a   :  { %714 = dma.done.wait [#allocation4], 1024  }
 0x15b   :  { %715 = vsyncadd [#allocation4], 4294966272 }
 0x15c   :  { %716 = dma.done.wait [#allocation9], 128  }
 0x15d   :  { %717 = vsyncadd [#allocation9], 4294967168 }
 0x15e   :  { %437 = vsyncpa [#allocation3], 1 }
 0x15f   :  { %438 = vsyncpa [#allocation6], 1 }
 0x160   :  { %439 = vsyncpa [#allocation4], 1 }
 0x161   :  { %440 = vsyncpa [#allocation9], 1 }

</bundles_post_ra>
